<compile_context>
chip_gen: v6e
topology: v6e:2x2x1
jax: 0.10.0
libtpu: 0.0.40
codegen_flags: <defaults>
</compile_context>

<pallas_src>
import functools

import jax
import jax.numpy as jnp
import numpy as np
from jax.experimental import pallas as pl
from jax.experimental.pallas import tpu as pltpu


# ---------------------------------------------------------------------------
# Pallas kernel: one batch tile = (Bt*C, Pp) resident in VMEM.
# ---------------------------------------------------------------------------
def _cmdf_kernel(W, Bt,
                 x2_ref, y2_ref, kb_ref, mask_ref,
                 wdw_ref, bdw_ref, wsx_ref, wsy_ref,
                 woa_ref, wob_ref, bo_ref,
                 out_ref):
    x2 = x2_ref[0]                           # (BC, Pp) compute dtype
    y2 = y2_ref[0]                           # (BC, Pp) compute dtype
    wdw = wdw_ref[...]                       # (BC, 9)  depthwise 3x3 weights
    kb = kb_ref[0]                           # (BC, 9)  f32, bs[k] + k_channel
    BC, Pp = x2.shape

    def tap(k):
        # Zero-padded 3x3 tap k of x2: XLU lane rotate * precomputed 0/1 mask.
        if k == 4:
            return x2                        # center tap: identity, no mask
        di, dj = k // 3 - 1, k % 3 - 1
        shift = (-(di * W + dj)) % Pp
        return pltpu.roll(x2, shift=shift, axis=1) * mask_ref[k:k + 1, :]

    # ---- pass 1: static depthwise 3x3 conv (f32 accumulation)
    x_static = (x2 * wdw[:, 4:5]).astype(jnp.float32)
    for k in range(9):
        if k == 4:
            continue
        x_static = x_static + tap(k) * wdw[:, k:k + 1]
    x_static = x_static + bdw_ref[...]       # (BC, Pp) f32

    # ---- spatial 1x1 conv -> per-pixel dynamic coefficients, hoisted to 2 dots
    xs_c = x_static.astype(x2.dtype)         # matmul operand in compute dtype
    ks = (jnp.dot(wsx_ref[...], xs_c, preferred_element_type=jnp.float32)
          + jnp.dot(wsy_ref[...], y2, preferred_element_type=jnp.float32))
    # Bt == 1: ks is (9, Pp) — row k applies to every channel.
    # Bt  > 1: ks is (9*BC, Pp) — rows [k*BC, (k+1)*BC) are tap k, already
    #          replicated across each packed batch's C channel sublanes.

    # ---- pass 2: dynamic filtering; taps recomputed (no VMEM staging scratch)
    x_dyn = jnp.zeros_like(x_static)         # f32 accumulator
    for k in range(9):
        if Bt == 1:
            coeff = ks[k:k + 1, :] + kb[:, k:k + 1]            # (BC, Pp) f32
        else:
            coeff = ks[k * BC:(k + 1) * BC, :] + kb[:, k:k + 1]
        x_dyn = x_dyn + tap(k) * coeff.astype(x2.dtype)

    # ---- output 1x1 projection (two half matmuls instead of a concat)
    out = (jnp.dot(woa_ref[...], xs_c, preferred_element_type=jnp.float32)
           + jnp.dot(wob_ref[...], x_dyn.astype(x2.dtype),
                     preferred_element_type=jnp.float32)
           + bo_ref[...])
    out_ref[0] = out.astype(out_ref.dtype)


def _full_spec(shape):
    n = len(shape)
    return pl.BlockSpec(shape, lambda b, _n=n: (0,) * _n)


def _pick_bt(B, C):
    """Batch-pack factor: fill the 8 f32 sublanes when C is small."""
    if C >= 8:
        return 1
    bt = max(1, 8 // C)
    while bt > 1 and B % bt:
        bt -= 1
    return bt


def _block_diag(w, Bt):
    """(O, C) -> (Bt*O, Bt*C) block-diagonal replication (identity for Bt == 1)."""
    if Bt == 1:
        return w
    eye = jnp.eye(Bt, dtype=w.dtype)
    O, C = w.shape
    t = eye[:, None, :, None] * w[None, :, None, :]              # (Bt, O, Bt, C)
    return t.reshape(Bt * O, Bt * C)


def _expand_tap_weight(w_half, Bt, C):
    """(9, C) -> (9*Bt*C, Bt*C) flattened per-tap batch-block weights.

    Row (k, b, c), col (b2, c2) = w_half[k, c2] * (b == b2): one big dot both
    applies the 1x1 conv per packed batch and replicates across its C sublanes.
    """
    eye = jnp.eye(Bt, dtype=w_half.dtype)
    t = eye[None, :, None, :, None] * w_half[:, None, None, None, :]  # (9,Bt,1,Bt,C)
    t = jnp.broadcast_to(t, (9, Bt, C, Bt, C))
    return t.reshape(9 * Bt * C, Bt * C)


def _vmem_limit_bytes():
    cap = 64 * 1024 * 1024
    try:
        cap = int(pltpu.get_tpu_info().vmem_capacity_bytes)
    except Exception:
        pass
    # physical - 24 MiB headroom, clamped: ~104 MiB on v5e/v6e, ~40 MiB on v7x.
    return int(min(112 * 1024 * 1024, max(32 * 1024 * 1024, cap - 24 * 1024 * 1024)))


# ---------------------------------------------------------------------------
# Wrapper: hoisted channel path + layout plumbing + pallas_call
# ---------------------------------------------------------------------------
def cmdf_forward(x2, y2, params, *, compute_dtype=jnp.float32):
    B, C, H, W = x2.shape
    P = H * W
    Pp = ((P + 127) // 128) * 128            # lane-dense padded spatial extent
    Bt = _pick_bt(B, C)
    nbt = B // Bt
    BC = Bt * C
    cdt = compute_dtype

    x2f = x2.astype(jnp.float32)
    y2f = y2.astype(jnp.float32)

    wdw = params["wdw"].reshape(C, 9).astype(jnp.float32)
    bdw = params["bdw"].astype(jnp.float32)                  # (C,)
    ws = params["ws"].astype(jnp.float32)                    # (9, 2C)
    bs = params["bs"].astype(jnp.float32)                    # (9,)
    w1 = params["w1"].astype(jnp.float32)                    # (Cr, 2C)
    b1 = params["b1"].astype(jnp.float32)
    w2 = params["w2"].astype(jnp.float32)                    # (9C, Cr)
    b2 = params["b2"].astype(jnp.float32)
    wo = params["wo"].astype(jnp.float32)                    # (C, 2C)
    bo = params["bo"].astype(jnp.float32)                    # (C,)

    # ---- channel-kernel path hoisted out of the Pallas kernel (tiny per-batch
    # work).  GAP(x_static) from 9 boundary-clipped region sums computed via
    # inclusion-exclusion: one full-plane sum + row/col strips, no 9x re-reads.
    total = x2f.sum(axis=(2, 3))                             # (B, C)
    rowsum = x2f.sum(axis=3)                                 # (B, C, H)
    colsum = x2f.sum(axis=2)                                 # (B, C, W)
    sums = []
    for di in (-1, 0, 1):
        rdrop = None if di == 0 else (H - 1 if di == -1 else 0)
        for dj in (-1, 0, 1):
            cdrop = None if dj == 0 else (W - 1 if dj == -1 else 0)
            s = total
            if rdrop is not None:
                s = s - rowsum[:, :, rdrop]
            if cdrop is not None:
                s = s - colsum[:, :, cdrop]
            if rdrop is not None and cdrop is not None:
                s = s + x2f[:, :, rdrop, cdrop]
            sums.append(s)
    S = jnp.stack(sums, axis=-1)                             # (B, C, 9)
    gap_static = (S * wdw[None]).sum(-1) / P + bdw[None]     # (B, C)
    gap_y = y2f.mean(axis=(2, 3))                            # (B, C)
    gap = jnp.concatenate([gap_static, gap_y], axis=1)       # (B, 2C)
    h1 = jnp.maximum(gap @ w1.T + b1[None], 0.0)             # (B, Cr)
    kchan = (h1 @ w2.T + b2[None]).reshape(B, C, 9)          # PyTorch (c, k) order
    kb = (kchan + bs[None, None, :]).reshape(nbt, BC, 9)     # bs folded in (f32)

    # ---- precomputed zero-pad boundary masks (batch invariant; padded lanes 0)
    q = np.arange(P)
    row, col = q // W, q % W
    m = np.zeros((9, Pp), np.float32)
    ki = 0
    for di in (-1, 0, 1):
        for dj in (-1, 0, 1):
            m[ki, :P] = (((row + di) >= 0) & ((row + di) < H) &
                         ((col + dj) >= 0) & ((col + dj) < W))
            ki += 1
    masks = jnp.asarray(m).astype(cdt)

    # ---- batch-packed weights (compute dtype -> native-rate MXU when bf16)
    ws_x, ws_y = ws[:, :C], ws[:, C:]
    if Bt == 1:
        wsx_in, wsy_in = ws_x.astype(cdt), ws_y.astype(cdt)  # (9, C)
    else:
        wsx_in = _expand_tap_weight(ws_x, Bt, C).astype(cdt)  # (9*BC, BC)
        wsy_in = _expand_tap_weight(ws_y, Bt, C).astype(cdt)
    woa_blk = _block_diag(wo[:, :C], Bt).astype(cdt)          # (BC, BC)
    wob_blk = _block_diag(wo[:, C:], Bt).astype(cdt)          # (BC, BC)
    wdw_blk = jnp.tile(wdw, (Bt, 1)).astype(cdt)              # (BC, 9)
    bdw_blk = jnp.tile(bdw.reshape(C, 1), (Bt, 1))            # (BC, 1) f32
    bo_blk = jnp.tile(bo.reshape(C, 1), (Bt, 1))              # (BC, 1) f32

    # ---- pure reshape (B,C,H,W) -> (nbt, Bt*C, P), lane-dense pad to Pp
    x2p = x2f.reshape(nbt, BC, P)
    y2p = y2f.reshape(nbt, BC, P)
    if Pp != P:
        pad = ((0, 0), (0, 0), (0, Pp - P))
        x2p = jnp.pad(x2p, pad)
        y2p = jnp.pad(y2p, pad)
    x2p = x2p.astype(cdt)
    y2p = y2p.astype(cdt)

    kernel = functools.partial(_cmdf_kernel, W, Bt)

    out_p = pl.pallas_call(
        kernel,
        out_shape=jax.ShapeDtypeStruct((nbt, BC, Pp), jnp.float32),
        grid=(nbt,),
        in_specs=[
            pl.BlockSpec((1, BC, Pp), lambda b: (b, 0, 0)),   # x2 (packed)
            pl.BlockSpec((1, BC, Pp), lambda b: (b, 0, 0)),   # y2 (packed)
            pl.BlockSpec((1, BC, 9), lambda b: (b, 0, 0)),    # kb = bs + k_channel
            _full_spec((9, Pp)),                              # boundary masks
            _full_spec((BC, 9)), _full_spec((BC, 1)),         # depthwise w / b
            _full_spec(wsx_in.shape), _full_spec(wsy_in.shape),  # spatial-kernel halves
            _full_spec((BC, BC)), _full_spec((BC, BC)),       # out-proj halves
            _full_spec((BC, 1)),                              # out-proj bias
        ],
        out_specs=pl.BlockSpec((1, BC, Pp), lambda b: (b, 0, 0)),
        compiler_params=pltpu.CompilerParams(
            dimension_semantics=("parallel",),                # batch tiles independent
            vmem_limit_bytes=_vmem_limit_bytes()),
    )(x2p, y2p, kb, masks, wdw_blk, bdw_blk, wsx_in, wsy_in, woa_blk, wob_blk, bo_blk)

    out = out_p[:, :, :P].reshape(B, C, H, W)
    return out, y2


# ---------------------------------------------------------------------------
# Deterministic parameter init (shapes from CMDF.__init__)
# ---------------------------------------------------------------------------
def init_params(key, in_channels, kernel_size=3, channel_reduction=4):
    c_half = in_channels // 2
    k_sq = kernel_size * kernel_size
    cr = in_channels // channel_reduction
    ks = jax.random.split(key, 10)

    def w(k, shape, fan_in):
        return jax.random.normal(k, shape, jnp.float32) * (1.0 / np.sqrt(fan_in))

    return {
        "wdw": w(ks[0], (c_half, 1, kernel_size, kernel_size), k_sq),
        "bdw": w(ks[1], (c_half,), k_sq),
        "ws":  w(ks[2], (k_sq, in_channels), in_channels),
        "bs":  w(ks[3], (k_sq,), in_channels),
        "w1":  w(ks[4], (cr, in_channels), in_channels),
        "b1":  w(ks[5], (cr,), in_channels),
        "w2":  w(ks[6], (c_half * k_sq, cr), cr),
        "b2":  w(ks[7], (c_half * k_sq,), cr),
        "wo":  w(ks[8], (c_half, in_channels), in_channels),
        "bo":  w(ks[9], (c_half,), in_channels),
    }


# ---------------------------------------------------------------------------
# Pure-JAX reference (mirrors the PyTorch forward exactly) for validation.
# ---------------------------------------------------------------------------
def cmdf_ref(x2, y2, params):
    B, C, H, W = x2.shape
    xp = jnp.pad(x2, ((0, 0), (0, 0), (1, 1), (1, 1)))
    taps = jnp.stack([xp[:, :, ki:ki + H, kj:kj + W]
                      for ki in range(3) for kj in range(3)], axis=2)     # (B,C,9,H,W)
    wdw = params["wdw"].reshape(C, 9)
    x_static = jnp.einsum('bckhw,ck->bchw', taps, wdw) + params["bdw"].reshape(1, C, 1, 1)
    fused = jnp.concatenate([x_static, y2], axis=1)                       # (B,2C,H,W)
    ksp = jnp.einsum('oc,bchw->bohw', params["ws"], fused) + params["bs"].reshape(1, -1, 1, 1)
    gap = jnp.mean(fused, axis=(2, 3))                                    # (B,2C)
    h1 = jnp.maximum(gap @ params["w1"].T + params["b1"][None], 0.0)
    kc = (h1 @ params["w2"].T + params["b2"][None]).reshape(B, C, 9)
    kdyn = ksp[:, None] + kc[:, :, :, None, None]                         # (B,C,9,H,W)
    x_dyn = jnp.einsum('bckhw,bckhw->bchw', taps, kdyn)
    cat = jnp.concatenate([x_static, x_dyn], axis=1)
    out = jnp.einsum('oc,bchw->bohw', params["wo"], cat) + params["bo"].reshape(1, C, 1, 1)
    return out, y2


if __name__ == "__main__":
    key = jax.random.PRNGKey(0)
    B, H, W = 2, 16, 16

    # Two configs: C=4 exercises the batch-packed (Bt=2) path, C=8 the Bt=1 path.
    for in_channels in (8, 16):
        c_half = in_channels // 2
        kx, ky, kp = jax.random.split(jax.random.fold_in(key, in_channels), 3)
        x2 = jax.random.normal(kx, (B, c_half, H, W), jnp.float32)
        y2 = jax.random.normal(ky, (B, c_half, H, W), jnp.float32)
        params = init_params(kp, in_channels)

        ref_out, _ = cmdf_ref(x2, y2, params)

        # f32 path: tight check against the reference.
        out, y_out = cmdf_forward(x2, y2, params, compute_dtype=jnp.float32)
        out = jax.block_until_ready(out)
        np.testing.assert_allclose(np.asarray(out), np.asarray(ref_out),
                                   atol=2e-4, rtol=2e-4)
        np.testing.assert_allclose(np.asarray(y_out), np.asarray(y2))

        # bf16 path (packed VPU + native-rate MXU on v6e/v7x): loose sanity check.
        out_bf, _ = cmdf_forward(x2, y2, params, compute_dtype=jnp.bfloat16)
        out_bf = jax.block_until_ready(out_bf)
        err = float(np.max(np.abs(np.asarray(out_bf) - np.asarray(ref_out))))
        scale = float(np.max(np.abs(np.asarray(ref_out))))
        assert err < 0.05 * scale + 0.05, f"bf16 path error {err} too large (scale {scale})"

    print("KERNEL_OK")
</pallas_src>

<mosaic_0001>
module attributes {stable_mosaic.version = 11 : i64} {
  func.func @_cmdf_kernel(%arg0: i32, %arg1: memref<1x8x256xf32, #tpu.memory_space<vmem>>, %arg2: memref<1x8x256xf32, #tpu.memory_space<vmem>>, %arg3: memref<1x8x9xf32, #tpu.memory_space<vmem>>, %arg4: memref<9x256xf32, #tpu.memory_space<vmem>>, %arg5: memref<8x9xf32, #tpu.memory_space<vmem>>, %arg6: memref<8x1xf32, #tpu.memory_space<vmem>>, %arg7: memref<72x8xf32, #tpu.memory_space<vmem>>, %arg8: memref<72x8xf32, #tpu.memory_space<vmem>>, %arg9: memref<8x8xf32, #tpu.memory_space<vmem>>, %arg10: memref<8x8xf32, #tpu.memory_space<vmem>>, %arg11: memref<8x1xf32, #tpu.memory_space<vmem>>, %arg12: memref<1x8x256xf32, #tpu.memory_space<vmem>>) attributes {dimension_semantics = [#tpu.dimension_semantics<parallel>], iteration_bounds = array<i64: 1>, scalar_prefetch = 0 : i64, scratch_operands = 0 : i64, tpu.core_type = #tpu.core_type<tc>, window_params = [{transform_indices = @transform_0, window_bounds = array<i64: 1, 8, 256>}, {transform_indices = @transform_1, window_bounds = array<i64: 1, 8, 256>}, {transform_indices = @transform_2, window_bounds = array<i64: 1, 8, 9>}, {pipeline_mode = #tpu.pipeline_mode<synchronous>, transform_indices = @transform_3, window_bounds = array<i64: 9, 256>}, {pipeline_mode = #tpu.pipeline_mode<synchronous>, transform_indices = @transform_4, window_bounds = array<i64: 8, 9>}, {pipeline_mode = #tpu.pipeline_mode<synchronous>, transform_indices = @transform_5, window_bounds = array<i64: 8, 1>}, {pipeline_mode = #tpu.pipeline_mode<synchronous>, transform_indices = @transform_6, window_bounds = array<i64: 72, 8>}, {pipeline_mode = #tpu.pipeline_mode<synchronous>, transform_indices = @transform_7, window_bounds = array<i64: 72, 8>}, {pipeline_mode = #tpu.pipeline_mode<synchronous>, transform_indices = @transform_8, window_bounds = array<i64: 8, 8>}, {pipeline_mode = #tpu.pipeline_mode<synchronous>, transform_indices = @transform_9, window_bounds = array<i64: 8, 8>}, {pipeline_mode = #tpu.pipeline_mode<synchronous>, transform_indices = @transform_10, window_bounds = array<i64: 8, 1>}, {transform_indices = @transform_11, window_bounds = array<i64: 1, 8, 256>}]} {
    %c0 = arith.constant 0 : index
    %c0_0 = arith.constant 0 : index
    %c0_1 = arith.constant 0 : index
    %0 = vector.load %arg1[%c0, %c0_0, %c0_1] : memref<1x8x256xf32, #tpu.memory_space<vmem>>, vector<1x8x256xf32>
    %1 = vector.shape_cast %0 : vector<1x8x256xf32> to vector<8x256xf32>
    %c0_2 = arith.constant 0 : index
    %c0_3 = arith.constant 0 : index
    %c0_4 = arith.constant 0 : index
    %2 = vector.load %arg2[%c0_2, %c0_3, %c0_4] : memref<1x8x256xf32, #tpu.memory_space<vmem>>, vector<1x8x256xf32>
    %3 = vector.shape_cast %2 : vector<1x8x256xf32> to vector<8x256xf32>
    %c0_5 = arith.constant 0 : index
    %c0_6 = arith.constant 0 : index
    %4 = vector.load %arg5[%c0_5, %c0_6] : memref<8x9xf32, #tpu.memory_space<vmem>>, vector<8x9xf32>
    %c0_7 = arith.constant 0 : index
    %c0_8 = arith.constant 0 : index
    %c0_9 = arith.constant 0 : index
    %5 = vector.load %arg3[%c0_7, %c0_8, %c0_9] : memref<1x8x9xf32, #tpu.memory_space<vmem>>, vector<1x8x9xf32>
    %6 = vector.shape_cast %5 : vector<1x8x9xf32> to vector<8x9xf32>
    %7 = vector.extract_strided_slice %4 {offsets = [0, 4], sizes = [8, 1], strides = [1, 1]} : vector<8x9xf32> to vector<8x1xf32>
    %8 = vector.broadcast %7 : vector<8x1xf32> to vector<8x256xf32>
    %9 = arith.mulf %1, %8 : vector<8x256xf32>
    %c17_i32 = arith.constant 17 : i32
    %10 = tpu.dynamic_rotate %1 by %c17_i32 dim 1 : vector<8x256xf32>, i32 -> vector<8x256xf32>
    %c0_10 = arith.constant 0 : index
    %c0_11 = arith.constant 0 : index
    %11 = vector.load %arg4[%c0_10, %c0_11] : memref<9x256xf32, #tpu.memory_space<vmem>>, vector<1x256xf32>
    %12 = vector.broadcast %11 : vector<1x256xf32> to vector<8x256xf32>
    %13 = arith.mulf %10, %12 : vector<8x256xf32>
    %14 = vector.extract_strided_slice %4 {offsets = [0, 0], sizes = [8, 1], strides = [1, 1]} : vector<8x9xf32> to vector<8x1xf32>
    %15 = vector.broadcast %14 : vector<8x1xf32> to vector<8x256xf32>
    %16 = arith.mulf %13, %15 : vector<8x256xf32>
    %17 = arith.addf %9, %16 : vector<8x256xf32>
    %c16_i32 = arith.constant 16 : i32
    %18 = tpu.dynamic_rotate %1 by %c16_i32 dim 1 : vector<8x256xf32>, i32 -> vector<8x256xf32>
    %c1 = arith.constant 1 : index
    %c0_12 = arith.constant 0 : index
    %19 = vector.load %arg4[%c1, %c0_12] : memref<9x256xf32, #tpu.memory_space<vmem>>, vector<1x256xf32>
    %20 = vector.broadcast %19 : vector<1x256xf32> to vector<8x256xf32>
    %21 = arith.mulf %18, %20 : vector<8x256xf32>
    %22 = vector.extract_strided_slice %4 {offsets = [0, 1], sizes = [8, 1], strides = [1, 1]} : vector<8x9xf32> to vector<8x1xf32>
    %23 = vector.broadcast %22 : vector<8x1xf32> to vector<8x256xf32>
    %24 = arith.mulf %21, %23 : vector<8x256xf32>
    %25 = arith.addf %17, %24 : vector<8x256xf32>
    %c15_i32 = arith.constant 15 : i32
    %26 = tpu.dynamic_rotate %1 by %c15_i32 dim 1 : vector<8x256xf32>, i32 -> vector<8x256xf32>
    %c2 = arith.constant 2 : index
    %c0_13 = arith.constant 0 : index
    %27 = vector.load %arg4[%c2, %c0_13] : memref<9x256xf32, #tpu.memory_space<vmem>>, vector<1x256xf32>
    %28 = vector.broadcast %27 : vector<1x256xf32> to vector<8x256xf32>
    %29 = arith.mulf %26, %28 : vector<8x256xf32>
    %30 = vector.extract_strided_slice %4 {offsets = [0, 2], sizes = [8, 1], strides = [1, 1]} : vector<8x9xf32> to vector<8x1xf32>
    %31 = vector.broadcast %30 : vector<8x1xf32> to vector<8x256xf32>
    %32 = arith.mulf %29, %31 : vector<8x256xf32>
    %33 = arith.addf %25, %32 : vector<8x256xf32>
    %c1_i32 = arith.constant 1 : i32
    %34 = tpu.dynamic_rotate %1 by %c1_i32 dim 1 : vector<8x256xf32>, i32 -> vector<8x256xf32>
    %c3 = arith.constant 3 : index
    %c0_14 = arith.constant 0 : index
    %35 = vector.load %arg4[%c3, %c0_14] : memref<9x256xf32, #tpu.memory_space<vmem>>, vector<1x256xf32>
    %36 = vector.broadcast %35 : vector<1x256xf32> to vector<8x256xf32>
    %37 = arith.mulf %34, %36 : vector<8x256xf32>
    %38 = vector.extract_strided_slice %4 {offsets = [0, 3], sizes = [8, 1], strides = [1, 1]} : vector<8x9xf32> to vector<8x1xf32>
    %39 = vector.broadcast %38 : vector<8x1xf32> to vector<8x256xf32>
    %40 = arith.mulf %37, %39 : vector<8x256xf32>
    %41 = arith.addf %33, %40 : vector<8x256xf32>
    %c255_i32 = arith.constant 255 : i32
    %42 = tpu.dynamic_rotate %1 by %c255_i32 dim 1 : vector<8x256xf32>, i32 -> vector<8x256xf32>
    %c5 = arith.constant 5 : index
    %c0_15 = arith.constant 0 : index
    %43 = vector.load %arg4[%c5, %c0_15] : memref<9x256xf32, #tpu.memory_space<vmem>>, vector<1x256xf32>
    %44 = vector.broadcast %43 : vector<1x256xf32> to vector<8x256xf32>
    %45 = arith.mulf %42, %44 : vector<8x256xf32>
    %46 = vector.extract_strided_slice %4 {offsets = [0, 5], sizes = [8, 1], strides = [1, 1]} : vector<8x9xf32> to vector<8x1xf32>
    %47 = vector.broadcast %46 : vector<8x1xf32> to vector<8x256xf32>
    %48 = arith.mulf %45, %47 : vector<8x256xf32>
    %49 = arith.addf %41, %48 : vector<8x256xf32>
    %c241_i32 = arith.constant 241 : i32
    %50 = tpu.dynamic_rotate %1 by %c241_i32 dim 1 : vector<8x256xf32>, i32 -> vector<8x256xf32>
    %c6 = arith.constant 6 : index
    %c0_16 = arith.constant 0 : index
    %51 = vector.load %arg4[%c6, %c0_16] : memref<9x256xf32, #tpu.memory_space<vmem>>, vector<1x256xf32>
    %52 = vector.broadcast %51 : vector<1x256xf32> to vector<8x256xf32>
    %53 = arith.mulf %50, %52 : vector<8x256xf32>
    %54 = vector.extract_strided_slice %4 {offsets = [0, 6], sizes = [8, 1], strides = [1, 1]} : vector<8x9xf32> to vector<8x1xf32>
    %55 = vector.broadcast %54 : vector<8x1xf32> to vector<8x256xf32>
    %56 = arith.mulf %53, %55 : vector<8x256xf32>
    %57 = arith.addf %49, %56 : vector<8x256xf32>
    %c240_i32 = arith.constant 240 : i32
    %58 = tpu.dynamic_rotate %1 by %c240_i32 dim 1 : vector<8x256xf32>, i32 -> vector<8x256xf32>
    %c7 = arith.constant 7 : index
    %c0_17 = arith.constant 0 : index
    %59 = vector.load %arg4[%c7, %c0_17] : memref<9x256xf32, #tpu.memory_space<vmem>>, vector<1x256xf32>
    %60 = vector.broadcast %59 : vector<1x256xf32> to vector<8x256xf32>
    %61 = arith.mulf %58, %60 : vector<8x256xf32>
    %62 = vector.extract_strided_slice %4 {offsets = [0, 7], sizes = [8, 1], strides = [1, 1]} : vector<8x9xf32> to vector<8x1xf32>
    %63 = vector.broadcast %62 : vector<8x1xf32> to vector<8x256xf32>
    %64 = arith.mulf %61, %63 : vector<8x256xf32>
    %65 = arith.addf %57, %64 : vector<8x256xf32>
    %c239_i32 = arith.constant 239 : i32
    %66 = tpu.dynamic_rotate %1 by %c239_i32 dim 1 : vector<8x256xf32>, i32 -> vector<8x256xf32>
    %c8 = arith.constant 8 : index
    %c0_18 = arith.constant 0 : index
    %67 = vector.load %arg4[%c8, %c0_18] : memref<9x256xf32, #tpu.memory_space<vmem>>, vector<1x256xf32>
    %68 = vector.broadcast %67 : vector<1x256xf32> to vector<8x256xf32>
    %69 = arith.mulf %66, %68 : vector<8x256xf32>
    %70 = vector.extract_strided_slice %4 {offsets = [0, 8], sizes = [8, 1], strides = [1, 1]} : vector<8x9xf32> to vector<8x1xf32>
    %71 = vector.broadcast %70 : vector<8x1xf32> to vector<8x256xf32>
    %72 = arith.mulf %69, %71 : vector<8x256xf32>
    %73 = arith.addf %65, %72 : vector<8x256xf32>
    %c0_19 = arith.constant 0 : index
    %c0_20 = arith.constant 0 : index
    %74 = vector.load %arg6[%c0_19, %c0_20] : memref<8x1xf32, #tpu.memory_space<vmem>>, vector<8x1xf32>
    %75 = vector.broadcast %74 : vector<8x1xf32> to vector<8x256xf32>
    %76 = arith.addf %73, %75 : vector<8x256xf32>
    %c0_21 = arith.constant 0 : index
    %c0_22 = arith.constant 0 : index
    %77 = vector.load %arg7[%c0_21, %c0_22] : memref<72x8xf32, #tpu.memory_space<vmem>>, vector<72x8xf32>
    %cst = arith.constant dense<0.000000e+00> : vector<72x256xf32>
    %78 = tpu.matmul %77, %76, %cst {dimension_numbers = #tpu.dot_dimension_numbers<[1], [0], [0], [1], [0, 0, 1, 1], [], []>} : vector<72x8xf32>, vector<8x256xf32>, vector<72x256xf32> -> vector<72x256xf32>
    %c0_23 = arith.constant 0 : index
    %c0_24 = arith.constant 0 : index
    %79 = vector.load %arg8[%c0_23, %c0_24] : memref<72x8xf32, #tpu.memory_space<vmem>>, vector<72x8xf32>
    %cst_25 = arith.constant dense<0.000000e+00> : vector<72x256xf32>
    %80 = tpu.matmul %79, %3, %cst_25 {dimension_numbers = #tpu.dot_dimension_numbers<[1], [0], [0], [1], [0, 0, 1, 1], [], []>} : vector<72x8xf32>, vector<8x256xf32>, vector<72x256xf32> -> vector<72x256xf32>
    %81 = arith.addf %78, %80 : vector<72x256xf32>
    %cst_26 = arith.constant 0.000000e+00 : f32
    %82 = vector.broadcast %cst_26 : f32 to vector<8x256xf32>
    %83 = vector.extract_strided_slice %81 {offsets = [0, 0], sizes = [8, 256], strides = [1, 1]} : vector<72x256xf32> to vector<8x256xf32>
    %84 = vector.extract_strided_slice %6 {offsets = [0, 0], sizes = [8, 1], strides = [1, 1]} : vector<8x9xf32> to vector<8x1xf32>
    %85 = vector.broadcast %84 : vector<8x1xf32> to vector<8x256xf32>
    %86 = arith.addf %83, %85 : vector<8x256xf32>
    %c17_i32_27 = arith.constant 17 : i32
    %87 = tpu.dynamic_rotate %1 by %c17_i32_27 dim 1 : vector<8x256xf32>, i32 -> vector<8x256xf32>
    %c0_28 = arith.constant 0 : index
    %c0_29 = arith.constant 0 : index
    %88 = vector.load %arg4[%c0_28, %c0_29] : memref<9x256xf32, #tpu.memory_space<vmem>>, vector<1x256xf32>
    %89 = vector.broadcast %88 : vector<1x256xf32> to vector<8x256xf32>
    %90 = arith.mulf %87, %89 : vector<8x256xf32>
    %91 = arith.mulf %90, %86 : vector<8x256xf32>
    %92 = arith.addf %82, %91 : vector<8x256xf32>
    %93 = vector.extract_strided_slice %81 {offsets = [8, 0], sizes = [8, 256], strides = [1, 1]} : vector<72x256xf32> to vector<8x256xf32>
    %94 = vector.extract_strided_slice %6 {offsets = [0, 1], sizes = [8, 1], strides = [1, 1]} : vector<8x9xf32> to vector<8x1xf32>
    %95 = vector.broadcast %94 : vector<8x1xf32> to vector<8x256xf32>
    %96 = arith.addf %93, %95 : vector<8x256xf32>
    %c16_i32_30 = arith.constant 16 : i32
    %97 = tpu.dynamic_rotate %1 by %c16_i32_30 dim 1 : vector<8x256xf32>, i32 -> vector<8x256xf32>
    %c1_31 = arith.constant 1 : index
    %c0_32 = arith.constant 0 : index
    %98 = vector.load %arg4[%c1_31, %c0_32] : memref<9x256xf32, #tpu.memory_space<vmem>>, vector<1x256xf32>
    %99 = vector.broadcast %98 : vector<1x256xf32> to vector<8x256xf32>
    %100 = arith.mulf %97, %99 : vector<8x256xf32>
    %101 = arith.mulf %100, %96 : vector<8x256xf32>
    %102 = arith.addf %92, %101 : vector<8x256xf32>
    %103 = vector.extract_strided_slice %81 {offsets = [16, 0], sizes = [8, 256], strides = [1, 1]} : vector<72x256xf32> to vector<8x256xf32>
    %104 = vector.extract_strided_slice %6 {offsets = [0, 2], sizes = [8, 1], strides = [1, 1]} : vector<8x9xf32> to vector<8x1xf32>
    %105 = vector.broadcast %104 : vector<8x1xf32> to vector<8x256xf32>
    %106 = arith.addf %103, %105 : vector<8x256xf32>
    %c15_i32_33 = arith.constant 15 : i32
    %107 = tpu.dynamic_rotate %1 by %c15_i32_33 dim 1 : vector<8x256xf32>, i32 -> vector<8x256xf32>
    %c2_34 = arith.constant 2 : index
    %c0_35 = arith.constant 0 : index
    %108 = vector.load %arg4[%c2_34, %c0_35] : memref<9x256xf32, #tpu.memory_space<vmem>>, vector<1x256xf32>
    %109 = vector.broadcast %108 : vector<1x256xf32> to vector<8x256xf32>
    %110 = arith.mulf %107, %109 : vector<8x256xf32>
    %111 = arith.mulf %110, %106 : vector<8x256xf32>
    %112 = arith.addf %102, %111 : vector<8x256xf32>
    %113 = vector.extract_strided_slice %81 {offsets = [24, 0], sizes = [8, 256], strides = [1, 1]} : vector<72x256xf32> to vector<8x256xf32>
    %114 = vector.extract_strided_slice %6 {offsets = [0, 3], sizes = [8, 1], strides = [1, 1]} : vector<8x9xf32> to vector<8x1xf32>
    %115 = vector.broadcast %114 : vector<8x1xf32> to vector<8x256xf32>
    %116 = arith.addf %113, %115 : vector<8x256xf32>
    %c1_i32_36 = arith.constant 1 : i32
    %117 = tpu.dynamic_rotate %1 by %c1_i32_36 dim 1 : vector<8x256xf32>, i32 -> vector<8x256xf32>
    %c3_37 = arith.constant 3 : index
    %c0_38 = arith.constant 0 : index
    %118 = vector.load %arg4[%c3_37, %c0_38] : memref<9x256xf32, #tpu.memory_space<vmem>>, vector<1x256xf32>
    %119 = vector.broadcast %118 : vector<1x256xf32> to vector<8x256xf32>
    %120 = arith.mulf %117, %119 : vector<8x256xf32>
    %121 = arith.mulf %120, %116 : vector<8x256xf32>
    %122 = arith.addf %112, %121 : vector<8x256xf32>
    %123 = vector.extract_strided_slice %81 {offsets = [32, 0], sizes = [8, 256], strides = [1, 1]} : vector<72x256xf32> to vector<8x256xf32>
    %124 = vector.extract_strided_slice %6 {offsets = [0, 4], sizes = [8, 1], strides = [1, 1]} : vector<8x9xf32> to vector<8x1xf32>
    %125 = vector.broadcast %124 : vector<8x1xf32> to vector<8x256xf32>
    %126 = arith.addf %123, %125 : vector<8x256xf32>
    %127 = arith.mulf %1, %126 : vector<8x256xf32>
    %128 = arith.addf %122, %127 : vector<8x256xf32>
    %129 = vector.extract_strided_slice %81 {offsets = [40, 0], sizes = [8, 256], strides = [1, 1]} : vector<72x256xf32> to vector<8x256xf32>
    %130 = vector.extract_strided_slice %6 {offsets = [0, 5], sizes = [8, 1], strides = [1, 1]} : vector<8x9xf32> to vector<8x1xf32>
    %131 = vector.broadcast %130 : vector<8x1xf32> to vector<8x256xf32>
    %132 = arith.addf %129, %131 : vector<8x256xf32>
    %c255_i32_39 = arith.constant 255 : i32
    %133 = tpu.dynamic_rotate %1 by %c255_i32_39 dim 1 : vector<8x256xf32>, i32 -> vector<8x256xf32>
    %c5_40 = arith.constant 5 : index
    %c0_41 = arith.constant 0 : index
    %134 = vector.load %arg4[%c5_40, %c0_41] : memref<9x256xf32, #tpu.memory_space<vmem>>, vector<1x256xf32>
    %135 = vector.broadcast %134 : vector<1x256xf32> to vector<8x256xf32>
    %136 = arith.mulf %133, %135 : vector<8x256xf32>
    %137 = arith.mulf %136, %132 : vector<8x256xf32>
    %138 = arith.addf %128, %137 : vector<8x256xf32>
    %139 = vector.extract_strided_slice %81 {offsets = [48, 0], sizes = [8, 256], strides = [1, 1]} : vector<72x256xf32> to vector<8x256xf32>
    %140 = vector.extract_strided_slice %6 {offsets = [0, 6], sizes = [8, 1], strides = [1, 1]} : vector<8x9xf32> to vector<8x1xf32>
    %141 = vector.broadcast %140 : vector<8x1xf32> to vector<8x256xf32>
    %142 = arith.addf %139, %141 : vector<8x256xf32>
    %c241_i32_42 = arith.constant 241 : i32
    %143 = tpu.dynamic_rotate %1 by %c241_i32_42 dim 1 : vector<8x256xf32>, i32 -> vector<8x256xf32>
    %c6_43 = arith.constant 6 : index
    %c0_44 = arith.constant 0 : index
    %144 = vector.load %arg4[%c6_43, %c0_44] : memref<9x256xf32, #tpu.memory_space<vmem>>, vector<1x256xf32>
    %145 = vector.broadcast %144 : vector<1x256xf32> to vector<8x256xf32>
    %146 = arith.mulf %143, %145 : vector<8x256xf32>
    %147 = arith.mulf %146, %142 : vector<8x256xf32>
    %148 = arith.addf %138, %147 : vector<8x256xf32>
    %149 = vector.extract_strided_slice %81 {offsets = [56, 0], sizes = [8, 256], strides = [1, 1]} : vector<72x256xf32> to vector<8x256xf32>
    %150 = vector.extract_strided_slice %6 {offsets = [0, 7], sizes = [8, 1], strides = [1, 1]} : vector<8x9xf32> to vector<8x1xf32>
    %151 = vector.broadcast %150 : vector<8x1xf32> to vector<8x256xf32>
    %152 = arith.addf %149, %151 : vector<8x256xf32>
    %c240_i32_45 = arith.constant 240 : i32
    %153 = tpu.dynamic_rotate %1 by %c240_i32_45 dim 1 : vector<8x256xf32>, i32 -> vector<8x256xf32>
    %c7_46 = arith.constant 7 : index
    %c0_47 = arith.constant 0 : index
    %154 = vector.load %arg4[%c7_46, %c0_47] : memref<9x256xf32, #tpu.memory_space<vmem>>, vector<1x256xf32>
    %155 = vector.broadcast %154 : vector<1x256xf32> to vector<8x256xf32>
    %156 = arith.mulf %153, %155 : vector<8x256xf32>
    %157 = arith.mulf %156, %152 : vector<8x256xf32>
    %158 = arith.addf %148, %157 : vector<8x256xf32>
    %159 = vector.extract_strided_slice %81 {offsets = [64, 0], sizes = [8, 256], strides = [1, 1]} : vector<72x256xf32> to vector<8x256xf32>
    %160 = vector.extract_strided_slice %6 {offsets = [0, 8], sizes = [8, 1], strides = [1, 1]} : vector<8x9xf32> to vector<8x1xf32>
    %161 = vector.broadcast %160 : vector<8x1xf32> to vector<8x256xf32>
    %162 = arith.addf %159, %161 : vector<8x256xf32>
    %c239_i32_48 = arith.constant 239 : i32
    %163 = tpu.dynamic_rotate %1 by %c239_i32_48 dim 1 : vector<8x256xf32>, i32 -> vector<8x256xf32>
    %c8_49 = arith.constant 8 : index
    %c0_50 = arith.constant 0 : index
    %164 = vector.load %arg4[%c8_49, %c0_50] : memref<9x256xf32, #tpu.memory_space<vmem>>, vector<1x256xf32>
    %165 = vector.broadcast %164 : vector<1x256xf32> to vector<8x256xf32>
    %166 = arith.mulf %163, %165 : vector<8x256xf32>
    %167 = arith.mulf %166, %162 : vector<8x256xf32>
    %168 = arith.addf %158, %167 : vector<8x256xf32>
    %c0_51 = arith.constant 0 : index
    %c0_52 = arith.constant 0 : index
    %169 = vector.load %arg9[%c0_51, %c0_52] : memref<8x8xf32, #tpu.memory_space<vmem>>, vector<8x8xf32>
    %cst_53 = arith.constant dense<0.000000e+00> : vector<8x256xf32>
    %170 = tpu.matmul %169, %76, %cst_53 {dimension_numbers = #tpu.dot_dimension_numbers<[1], [0], [0], [1], [0, 0, 1, 1], [], []>} : vector<8x8xf32>, vector<8x256xf32>, vector<8x256xf32> -> vector<8x256xf32>
    %c0_54 = arith.constant 0 : index
    %c0_55 = arith.constant 0 : index
    %171 = vector.load %arg10[%c0_54, %c0_55] : memref<8x8xf32, #tpu.memory_space<vmem>>, vector<8x8xf32>
    %cst_56 = arith.constant dense<0.000000e+00> : vector<8x256xf32>
    %172 = tpu.matmul %171, %168, %cst_56 {dimension_numbers = #tpu.dot_dimension_numbers<[1], [0], [0], [1], [0, 0, 1, 1], [], []>} : vector<8x8xf32>, vector<8x256xf32>, vector<8x256xf32> -> vector<8x256xf32>
    %173 = arith.addf %170, %172 : vector<8x256xf32>
    %c0_57 = arith.constant 0 : index
    %c0_58 = arith.constant 0 : index
    %174 = vector.load %arg11[%c0_57, %c0_58] : memref<8x1xf32, #tpu.memory_space<vmem>>, vector<8x1xf32>
    %175 = vector.broadcast %174 : vector<8x1xf32> to vector<8x256xf32>
    %176 = arith.addf %173, %175 : vector<8x256xf32>
    %c0_59 = arith.constant 0 : index
    %c0_60 = arith.constant 0 : index
    %c0_61 = arith.constant 0 : index
    %177 = vector.load %arg12[%c0_59, %c0_60, %c0_61] : memref<1x8x256xf32, #tpu.memory_space<vmem>>, vector<1x8x256xf32>
    %178 = vector.shape_cast %177 : vector<1x8x256xf32> to vector<8x256xf32>
    %179 = vector.shape_cast %176 : vector<8x256xf32> to vector<1x8x256xf32>
    tpu.vector_store %arg12[%c0_59, %c0_60, %c0_61], %179 {strides = array<i32>} : memref<1x8x256xf32, #tpu.memory_space<vmem>>, vector<1x8x256xf32>,
    return
  }
  func.func @transform_0(%arg0: i32) -> (i32, i32, i32) {
    %c0_i32 = arith.constant 0 : i32
    %c0_i32_0 = arith.constant 0 : i32
    %c0_i32_1 = arith.constant 0 : i32
    return %arg0, %c0_i32, %c0_i32_0 : i32, i32, i32
  }
  func.func @transform_1(%arg0: i32) -> (i32, i32, i32) {
    %c0_i32 = arith.constant 0 : i32
    %c0_i32_0 = arith.constant 0 : i32
    %c0_i32_1 = arith.constant 0 : i32
    return %arg0, %c0_i32, %c0_i32_0 : i32, i32, i32
  }
  func.func @transform_2(%arg0: i32) -> (i32, i32, i32) {
    %c0_i32 = arith.constant 0 : i32
    %c0_i32_0 = arith.constant 0 : i32
    %c0_i32_1 = arith.constant 0 : i32
    return %arg0, %c0_i32, %c0_i32_0 : i32, i32, i32
  }
  func.func @transform_3(%arg0: i32) -> (i32, i32) {
    %c0_i32 = arith.constant 0 : i32
    %c0_i32_0 = arith.constant 0 : i32
    %c0_i32_1 = arith.constant 0 : i32
    return %c0_i32, %c0_i32_0 : i32, i32
  }
  func.func @transform_4(%arg0: i32) -> (i32, i32) {
    %c0_i32 = arith.constant 0 : i32
    %c0_i32_0 = arith.constant 0 : i32
    %c0_i32_1 = arith.constant 0 : i32
    return %c0_i32, %c0_i32_0 : i32, i32
  }
  func.func @transform_5(%arg0: i32) -> (i32, i32) {
    %c0_i32 = arith.constant 0 : i32
    %c0_i32_0 = arith.constant 0 : i32
    %c0_i32_1 = arith.constant 0 : i32
    return %c0_i32, %c0_i32_0 : i32, i32
  }
  func.func @transform_6(%arg0: i32) -> (i32, i32) {
    %c0_i32 = arith.constant 0 : i32
    %c0_i32_0 = arith.constant 0 : i32
    %c0_i32_1 = arith.constant 0 : i32
    return %c0_i32, %c0_i32_0 : i32, i32
  }
  func.func @transform_7(%arg0: i32) -> (i32, i32) {
    %c0_i32 = arith.constant 0 : i32
    %c0_i32_0 = arith.constant 0 : i32
    %c0_i32_1 = arith.constant 0 : i32
    return %c0_i32, %c0_i32_0 : i32, i32
  }
  func.func @transform_8(%arg0: i32) -> (i32, i32) {
    %c0_i32 = arith.constant 0 : i32
    %c0_i32_0 = arith.constant 0 : i32
    %c0_i32_1 = arith.constant 0 : i32
    return %c0_i32, %c0_i32_0 : i32, i32
  }
  func.func @transform_9(%arg0: i32) -> (i32, i32) {
    %c0_i32 = arith.constant 0 : i32
    %c0_i32_0 = arith.constant 0 : i32
    %c0_i32_1 = arith.constant 0 : i32
    return %c0_i32, %c0_i32_0 : i32, i32
  }
  func.func @transform_10(%arg0: i32) -> (i32, i32) {
    %c0_i32 = arith.constant 0 : i32
    %c0_i32_0 = arith.constant 0 : i32
    %c0_i32_1 = arith.constant 0 : i32
    return %c0_i32, %c0_i32_0 : i32, i32
  }
  func.func @transform_11(%arg0: i32) -> (i32, i32, i32) {
    %c0_i32 = arith.constant 0 : i32
    %c0_i32_0 = arith.constant 0 : i32
    %c0_i32_1 = arith.constant 0 : i32
    return %arg0, %c0_i32, %c0_i32_0 : i32, i32, i32
  }
}

</mosaic_0001>

<bundles_post_ra>
// kernel: tpu_custom_call.1
= control target key start
LH: loop header
LB: loop body
LE: loop exit
PB: predicated region body
PF: predicated region fallthrough
CT: control target
= control target key end

     0   :  { %v966_v2 = vmov 4   ;;  %s967_s21 = smov 17   ;;  %v968_v4 = vmov 1   ;;  %s1351_s0 = inlined_call_operand.vmem [shape: f32[1,8,256], index: 0, kind: input, shape index: {}]   ;;  %s1352_s1 = inlined_call_operand.vmem [shape: f32[1,8,256], index: 1, kind: input, shape index: {}]   ;;  %s1353_s2 = inlined_call_operand.vmem [shape: f32[1,8,9], index: 2, kind: input, shape index: {}]   ;;  %s1354_s3 = inlined_call_operand.vmem [shape: f32[9,256], index: 3, kind: input, shape index: {}]   ;;  %s1355_s4 = inlined_call_operand.vmem [shape: f32[8,9], index: 4, kind: input, shape index: {}]   ;;  %s1356_s5 = inlined_call_operand.vmem [shape: f32[8,1], index: 5, kind: input, shape index: {}]   ;;  %s1357_s6 = inlined_call_operand.vmem [shape: f32[72,8], index: 6, kind: input, shape index: {}]   ;;  %s1358_s7 = inlined_call_operand.vmem [shape: f32[72,8], index: 7, kind: input, shape index: {}]   ;;  %s1359_s8 = inlined_call_operand.vmem [shape: f32[8,8], index: 8, kind: input, shape index: {}]   ;;  %s1360_s9 = inlined_call_operand.vmem [shape: f32[8,8], index: 9, kind: input, shape index: {}]   ;;  %s1361_s10 = inlined_call_operand.vmem [shape: f32[8,1], index: 10, kind: input, shape index: {}]   ;;  %s1362_s11 = inlined_call_operand.hbm [shape: f32[1,8,256], index: 11, kind: output, shape index: {}]  }
   0x1   :  { %v1048_v0 = vld [vmem:[%s1351_s0] sm:$0xff]  ;;  %923 = vset.pattern.permute.xlu0 %v966_v2  ;;  %v1058_v3 = vld [vmem:[%s1351_s0 + $0x8] sm:$0xff]  ;;  %925 = vset.pattern.permute.xlu1 %v968_v4 }
   0x2   :  { %v43_v1 = vld [vmem:[%s1355_s4] sm:$0xff]  ;;  %52 = vrot.lane.b32.xlu1 %v1048_v0, %s967_s21 }
   0x3   :  { %47 = vperm.xlu0 %923, %v43_v1  }
   0x4   :  { %16 = vsyncpa [#allocation3], 0  ;;  %v969_v5 = vmov 0   ;;  %s970_s4 = smov 16   ;;  %v971_v6 = vmov 2   ;;  %s972_s0 = smov 15   ;;  %v56_v34 = vlaneseq }
   0x5   :  { %v973_v7 = vmov 3   ;;  %v974_v8 = vmov 5   ;;  %s975_s24 = smov 1   ;;  %v976_v9 = vmov 6   ;;  %s977_s25 = smov 127   ;;  %v978_v10 = vmov 7  }
   0x6   :  { %54 = vrot.lane.b32.xlu1 %v1058_v3, %s967_s21  ;;  %v979_v11 = vmov 8   ;;  %s980_s26 = smov 113   ;;  %v293_v12 = vld [vmem:[%s1356_s5] sm:$0xff]  ;;  %s981_s29 = smov 112   ;;  %v42_v13 = vld [vmem:[%s1352_s1 + $0x8] sm:$0xff]  ;;  %vm319_vm0 = vcmask 64512  }
   0x7   :  { %924 = vset.pattern.permute.xlu0 %v969_v5  ;;  %s982_s30 = smov 111   ;;  %v41_v14 = vld [vmem:[%s1352_s1] sm:$0xff]  ;;  %377 = vmatprep.subr.mxu0 %v42_v13  ;;  %v983_v16 = vmov 0.0   ;;  %v311_v17 = vld [vmem:[%s1358_s7 + $0x8] sm:$0xff]  ;;  %v312_v18 = vld [vmem:[%s1358_s7 + $0x10] sm:$0xff]  ;;  %v64_v37 = vshrl.u32 %v56_v34, 7 }
   0x8   :  { %76 = vperm.xlu0 %924, %v43_v1   ;;  %v310_v15 = vld [vmem:[%s1358_s7] sm:$0xff]  ;;  %378 = vmatpush1.msra.mxu0 %v41_v14  ;;  %v313_v19 = vld [vmem:[%s1358_s7 + $0x18] sm:$0xff]  ;;  %v315_v21 = vld [vmem:[%s1358_s7 + $0x28] sm:$0xff]  ;;  %v1152_v39 = vand.u32 127, %v56_v34 }
   0x9   :  { %411 = vmatprep.mubr.f32.mxu0 %v983_v16  ;;  %557 = vmatprep.mubr.f32.mxu1 %v983_v16  ;;  %v314_v20 = vld [vmem:[%s1358_s7 + $0x20] sm:$0xff]  ;;  %v316_v22 = vld [vmem:[%s1358_s7 + $0x30] sm:$0xff]  ;;  %v317_v23 = vld [vmem:[%s1358_s7 + $0x38] sm:$0xff]  ;;  %v1154_v41 = vsub.s32 0, %v64_v37  ;;  %v1156_v42 = vsub.s32 1, %v64_v37 }
   0xa   :  { %106 = vperm.xlu1 %925, %v43_v1   ;;  %884 = vmatmul.mubr.msk.f32.vlgmr.msra.gmra.mxu0 %vm319_vm0, %v310_v15  ;;  %v318_v24 = vld [vmem:[%s1358_s7 + $0x40] sm:$0xff]  ;;  %vm58_vm1 = vcmp.lt.s32.totalorder %v1152_v39, 17  ;;  %vm87_vm2 = vcmp.lt.s32.totalorder %v1152_v39, 16  ;;  %vm117_vm3 = vcmp.lt.s32.totalorder %v1152_v39, 15  ;;  %vm147_vm4 = vcmp.lt.s32.totalorder %v1152_v39, 1 }
   0xb   :  { %417 = vmatprep.mubr.f32.mxu0 %v983_v16  ;;  %v44_v25 = vld [vmem:[%s1353_s2] sm:$0xff]  ;;  %vm177_vm5 = vcmp.lt.s32.totalorder %v1152_v39, 127  ;;  %vm207_vm6 = vcmp.lt.s32.totalorder %v1152_v39, 113  ;;  %vm237_vm7 = vcmp.lt.s32.totalorder %v1152_v39, 112  ;;  %vm267_vm8 = vcmp.lt.s32.totalorder %v1152_v39, 111 }
   0xc   :  { %83 = vrot.lane.b32.xlu0 %v1048_v0, %s970_s4  ;;  %v61_v44 = vld [vmem:[%s1354_s3] ss:$8 sm:$0x3]  ;;  %v877_v45 = vld [vmem:[%s1354_s3 + $0x1] ss:$8 sm:$0x3] }
   0xd   :  { %926 = vset.pattern.permute.xlu0 %v971_v6  ;;  %v878_v46 = vld [vmem:[%s1354_s3 + $0x2] ss:$8 sm:$0x3]  ;;  %v66_v48 = vrot.slane %v61_v44, %v1154_v41  ;;  %v70_v49 = vrot.slane %v61_v44, %v1156_v42  ;;  %v96_v50 = vrot.slane %v877_v45, %v1154_v41  ;;  %v879_v51 = vld [vmem:[%s1354_s3 + $0x3] ss:$8 sm:$0x3]  ;;  %v100_v55 = vrot.slane %v877_v45, %v1156_v42 }
   0xe   :  { %85 = vrot.lane.b32.xlu1 %v1058_v3, %s970_s4  ;;  %885 = vmatmul.mubr.msk.f32.gmra.mxu0 %vm319_vm0, %v311_v17  ;;  %v126_v58 = vrot.slane %v878_v46, %v1154_v41  ;;  %v130_v59 = vrot.slane %v878_v46, %v1156_v42  ;;  %v880_v60 = vld [vmem:[%s1354_s3 + $0x5] ss:$8 sm:$0x3]  ;;  %v156_v61 = vrot.slane %v879_v51, %v1154_v41 }
   0xf   :  { %933 = vset.pattern.permute.xlu1 %v969_v5  ;;  %423 = vmatprep.mubr.f32.mxu0 %v983_v16  ;;  %v160_v62 = vrot.slane %v879_v51, %v1156_v42 }
  0x10   :  { %136 = vperm.xlu0 %926, %v43_v1  }
  0x12   :  { %113 = vrot.lane.b32.xlu1 %v1048_v0, %s972_s0  ;;  %886 = vmatmul.mubr.msk.f32.gmra.mxu0 %vm319_vm0, %v312_v18 }
  0x13   :  { %429 = vmatprep.mubr.f32.mxu0 %v983_v16 }
  0x14   :  { %927 = vset.pattern.permute.xlu0 %v973_v7 }
  0x15   :  { %166 = vperm.xlu0 %927, %v43_v1  }
  0x16   :  { %115 = vrot.lane.b32.xlu1 %v1058_v3, %s972_s0  ;;  %887 = vmatmul.mubr.msk.f32.gmra.mxu0 %vm319_vm0, %v313_v19 }
  0x17   :  { %435 = vmatprep.mubr.f32.mxu0 %v983_v16 }
  0x19   :  { %928 = vset.pattern.permute.xlu0 %v974_v8 }
  0x1a   :  { %143 = vrot.lane.b32.xlu1 %v1048_v0, %s975_s24  ;;  %196 = vperm.xlu0 %928, %v43_v1  }
  0x1b   :  { %888 = vmatmul.mubr.msk.f32.gmra.mxu0 %vm319_vm0, %v314_v20 }
  0x1c   :  { %441 = vmatprep.mubr.f32.mxu0 %v983_v16 }
  0x1e   :  { %145 = vrot.lane.b32.xlu1 %v1058_v3, %s975_s24  ;;  %929 = vset.pattern.permute.xlu0 %v976_v9 }
  0x1f   :  { %226 = vperm.xlu0 %929, %v43_v1   ;;  %889 = vmatmul.mubr.msk.f32.gmra.mxu0 %vm319_vm0, %v315_v21 }
  0x20   :  { %447 = vmatprep.mubr.f32.mxu0 %v983_v16 }
  0x22   :  { %173 = vrot.lane.b32.xlu1 %v1048_v0, %s977_s25 }
  0x23   :  { %930 = vset.pattern.permute.xlu0 %v978_v10  ;;  %890 = vmatmul.mubr.msk.f32.gmra.mxu0 %vm319_vm0, %v316_v22 }
  0x24   :  { %256 = vperm.xlu0 %930, %v43_v1   ;;  %453 = vmatprep.mubr.f32.mxu0 %v983_v16 }
  0x26   :  { %175 = vrot.lane.b32.xlu1 %v1058_v3, %s977_s25 }
  0x27   :  { %891 = vmatmul.mubr.msk.f32.gmra.mxu0 %vm319_vm0, %v317_v23 }
  0x28   :  { %931 = vset.pattern.permute.xlu0 %v979_v11  ;;  %459 = vmatprep.mubr.f32.mxu0 %v983_v16 }
  0x29   :  { %286 = vperm.xlu0 %931, %v43_v1  }
  0x2a   :  { %203 = vrot.lane.b32.xlu1 %v1048_v0, %s980_s26 }
  0x2b   :  { %892 = vmatmul.mubr.msk.f32.gmra.mxu0 %vm319_vm0, %v318_v24 }
  0x2c   :  { %772 = vmatprep.mubr.f32.mxu0 %v983_v16 }
  0x2d   :  { %932 = vset.pattern.permute.xlu0 %v969_v5 }
  0x2e   :  { %205 = vrot.lane.b32.xlu1 %v1058_v3, %s980_s26  ;;  %296 = vperm.xlu0 %932, %v293_v12  }
  0x32   :  { %233 = vrot.lane.b32.xlu1 %v1048_v0, %s981_s29  ;;  %935 = vset.pattern.permute.xlu0 %v971_v6 }
  0x33   :  { %634 = vperm.xlu0 %935, %v44_v25  }
  0x36   :  { %235 = vrot.lane.b32.xlu1 %v1058_v3, %s981_s29 }
  0x37   :  { %938 = vset.pattern.permute.xlu0 %v974_v8 }
  0x38   :  { %664 = vperm.xlu0 %938, %v44_v25  }
  0x3a   :  { %263 = vrot.lane.b32.xlu1 %v1048_v0, %s982_s30 }
  0x3c   :  { %941 = vset.pattern.permute.xlu0 %v979_v11  ;;  %v881_v11 = vld [vmem:[%s1354_s3 + $0x6] ss:$8 sm:$0x3] }
  0x3d   :  { %694 = vperm.xlu0 %941, %v44_v25   ;;  %v216_v22 = vrot.slane %v881_v11, %v1154_v41  ;;  %v220_v23 = vrot.slane %v881_v11, %v1156_v42 }
  0x3e   :  { %265 = vrot.lane.b32.xlu1 %v1058_v3, %s982_s30 }
  0x41   :  { %943 = vset.pattern.permute.xlu0 %v969_v5 }
  0x42   :  { %614 = vperm.xlu1 %933, %v44_v25  }
  0x46   :  { %934 = vset.pattern.permute.xlu1 %v968_v4 }
  0x47   :  { %624 = vperm.xlu1 %934, %v44_v25  }
  0x4b   :  { %936 = vset.pattern.permute.xlu1 %v973_v7 }
  0x4c   :  { %644 = vperm.xlu1 %936, %v44_v25  }
  0x50   :  { %937 = vset.pattern.permute.xlu1 %v966_v2 }
  0x51   :  { %654 = vperm.xlu1 %937, %v44_v25  }
  0x55   :  { %939 = vset.pattern.permute.xlu1 %v976_v9  ;;  %v186_v9 = vrot.slane %v880_v60, %v1154_v41 }
  0x56   :  { %674 = vperm.xlu1 %939, %v44_v25  }
  0x5a   :  { %940 = vset.pattern.permute.xlu1 %v978_v10  ;;  %v190_v10 = vrot.slane %v880_v60, %v1156_v42 }
  0x5b   :  { %684 = vperm.xlu1 %940, %v44_v25  }
  0x5f   :  { %942 = vset.pattern.permute.xlu1 %v969_v5 }
  0x74   :  { %v53_v26 = vpop.permute.xlu1 %52 }
  0x78   :  { %v55_v27 = vpop.permute.xlu1 %54 }
  0x79   :  { %v59_v53 = vsel %vm58_vm1, %v53_v26, %v55_v27  ;;  %v60_v54 = vsel %vm58_vm1, %v55_v27, %v53_v26 }
  0x7a   :  { %v1186_v1 = vmul.f32 %v66_v48, %v60_v54  ;;  %v1188_v2 = vmul.f32 %v70_v49, %v59_v53 }
  0x7e   :  { %v48_v33 = vpop.permute.xlu0 %47 }
  0x7f   :  { %v50_v12 = vmul.f32 %v48_v33, %v1048_v0  ;;  %v51_v13 = vmul.f32 %v48_v33, %v1058_v3 }
  0x83   :  { %v77_v36 = vpop.permute.xlu0 %76 }
  0x84   :  { %v79_v14 = vmul.f32 %v77_v36, %v1186_v1  ;;  %v80_v15 = vmul.f32 %v77_v36, %v1188_v2 }
  0x85   :  { %v1150_v28 = vpop.permute.xlu1 %106 }
  0x87   :  { %v84_v40 = vpop.permute.xlu0 %83 }
  0x89   :  { %v86_v29 = vpop.permute.xlu1 %85 }
  0x8a   :  { %v88_v56 = vsel %vm87_vm2, %v84_v40, %v86_v29  ;;  %v89_v57 = vsel %vm87_vm2, %v86_v29, %v84_v40 }
  0x8b   :  { %v137_v47 = vpop.permute.xlu0 %136  ;;  %v1190_v7 = vmul.f32 %v96_v50, %v89_v57  ;;  %v1192_v8 = vmul.f32 %v100_v55, %v88_v56  ;;  %v883_v55 = vld [vmem:[%s1354_s3 + $0x10] ss:$8 sm:$0x3] }
  0x8d   :  { %v114_v30 = vpop.permute.xlu1 %113  ;;  %v109_v25 = vmul.f32 %v1150_v28, %v1190_v7  ;;  %v110_v26 = vmul.f32 %v1150_v28, %v1192_v8 }
  0x90   :  { %v167_v63 = vpop.permute.xlu0 %166 }
  0x91   :  { %v116_v31 = vpop.permute.xlu1 %115 }
  0x92   :  { %v118_v4 = vsel %vm117_vm3, %v114_v30, %v116_v31  ;;  %v119_v5 = vsel %vm117_vm3, %v116_v31, %v114_v30  ;;  %v882_v30 = vld [vmem:[%s1354_s3 + $0x7] ss:$8 sm:$0x3]  ;;  %v81_v31 = vadd.f32 %v79_v14, %v50_v12 }
  0x93   :  { %v1203_v17 = vmul.f32 %v126_v58, %v119_v5  ;;  %v1205_v18 = vmul.f32 %v130_v59, %v118_v4  ;;  %v246_v44 = vrot.slane %v882_v30, %v1154_v41  ;;  %v250_v45 = vrot.slane %v882_v30, %v1156_v42 }
  0x94   :  { %v111_v48 = vadd.f32 %v109_v25, %v81_v31  ;;  %v276_v4 = vrot.slane %v883_v55, %v1154_v41  ;;  %v280_v5 = vrot.slane %v883_v55, %v1156_v42 }
  0x95   :  { %v144_v32 = vpop.permute.xlu1 %143  ;;  %v197_v21 = vpop.permute.xlu0 %196  ;;  %v140_v28 = vmul.f32 %v137_v47, %v1205_v18 }
  0x99   :  { %v146_v35 = vpop.permute.xlu1 %145 }
  0x9a   :  { %v148_v19 = vsel %vm147_vm4, %v144_v32, %v146_v35  ;;  %v149_v20 = vsel %vm147_vm4, %v146_v35, %v144_v32  ;;  %v82_v32 = vadd.f32 %v80_v15, %v51_v13  ;;  %v139_v35 = vmul.f32 %v137_v47, %v1203_v17 }
  0x9b   :  { %v1226_v33 = vmul.f32 %v156_v61, %v149_v20  ;;  %v1228_v34 = vmul.f32 %v160_v62, %v148_v19 }
  0x9c   :  { %v112_v49 = vadd.f32 %v110_v26, %v82_v32  ;;  %v141_v56 = vadd.f32 %v139_v35, %v111_v48  ;;  %v308_v48 = vld [vmem:[%s1357_s6 + $0x38] sm:$0xff] }
  0x9d   :  { %v174_v38 = vpop.permute.xlu1 %173  ;;  %v169_v51 = vmul.f32 %v167_v63, %v1226_v33 }
  0x9e   :  { %v142_v57 = vadd.f32 %v140_v28, %v112_v49  ;;  %v301_v28 = vld [vmem:[%s1357_s6] sm:$0xff] }
  0x9f   :  { %v309_v49 = vld [vmem:[%s1357_s6 + $0x40] sm:$0xff] }
  0xa1   :  { %v176_v43 = vpop.permute.xlu1 %175 }
  0xa2   :  { %v178_v27 = vsel %vm177_vm5, %v174_v38, %v176_v43  ;;  %v179_v29 = vsel %vm177_vm5, %v176_v43, %v174_v38  ;;  %v227_v38 = vpop.permute.xlu0 %226 }
  0xa3   :  { %v1236_v40 = vmul.f32 %v186_v9, %v178_v27  ;;  %v1238_v43 = vmul.f32 %v190_v10, %v179_v29 }
  0xa5   :  { %v204_v52 = vpop.permute.xlu1 %203  ;;  %v199_v59 = vmul.f32 %v197_v21, %v1236_v40  ;;  %v200_v60 = vmul.f32 %v197_v21, %v1238_v43 }
  0xa6   :  { %v257_v58 = vpop.permute.xlu0 %256 }
  0xa9   :  { %v206_v6 = vpop.permute.xlu1 %205 }
  0xaa   :  { %v208_v36 = vsel %vm207_vm6, %v204_v52, %v206_v6  ;;  %v209_v37 = vsel %vm207_vm6, %v206_v6, %v204_v52  ;;  %v170_v52 = vmul.f32 %v167_v63, %v1228_v34  ;;  %v171_v6 = vadd.f32 %v169_v51, %v141_v56  ;;  %v287_v12 = vpop.permute.xlu0 %286 }
  0xab   :  { %v1248_v53 = vmul.f32 %v216_v22, %v208_v36  ;;  %v1250_v54 = vmul.f32 %v220_v23, %v209_v37  ;;  %v302_v36 = vld [vmem:[%s1357_s6 + $0x8] sm:$0xff]  ;;  %v303_v37 = vld [vmem:[%s1357_s6 + $0x10] sm:$0xff] }
  0xac   :  { %v172_v9 = vadd.f32 %v170_v52, %v142_v57  ;;  %v201_v13 = vadd.f32 %v199_v59, %v171_v6 }
  0xad   :  { %v234_v24 = vpop.permute.xlu1 %233  ;;  %v229_v10 = vmul.f32 %v227_v38, %v1248_v53  ;;  %v230_v11 = vmul.f32 %v227_v38, %v1250_v54  ;;  %v304_v38 = vld [vmem:[%s1357_s6 + $0x18] sm:$0xff] }
  0xae   :  { %v202_v14 = vadd.f32 %v200_v60, %v172_v9  ;;  %v297_v29 = vpop.permute.xlu0 %296 }
  0xaf   :  { %v231_v22 = vadd.f32 %v229_v10, %v201_v13 }
  0xb0   :  { %v232_v41 = vadd.f32 %v230_v11, %v202_v14 }
  0xb1   :  { %v236_v46 = vpop.permute.xlu1 %235 }
  0xb2   :  { %v238_v47 = vsel %vm237_vm7, %v234_v24, %v236_v46  ;;  %v239_v50 = vsel %vm237_vm7, %v236_v46, %v234_v24  ;;  %v307_v46 = vld [vmem:[%s1357_s6 + $0x30] sm:$0xff] }
  0xb3   :  { %v1257_v61 = vmul.f32 %v246_v44, %v238_v47  ;;  %v1259_v62 = vmul.f32 %v250_v45, %v239_v50  ;;  %v305_v44 = vld [vmem:[%s1357_s6 + $0x20] sm:$0xff]  ;;  %v306_v45 = vld [vmem:[%s1357_s6 + $0x28] sm:$0xff] }
  0xb4   :  { %v703_v47 = vld [vmem:[%s1359_s8] sm:$0xff] }
  0xb5   :  { %v264_v63 = vpop.permute.xlu1 %263  ;;  %v259_v15 = vmul.f32 %v257_v58, %v1257_v61  ;;  %v260_v19 = vmul.f32 %v257_v58, %v1259_v62  ;;  %v853_v50 = vld [vmem:[%s1361_s10] sm:$0xff]  ;;  %s984_s10 = smov [#allocation2]  }
  0xb6   :  { %856 = vperm.xlu1 %942, %v853_v50   ;;  %s869_s21 = sshll.u32 %s984_s10, 4  ;;  %s870_s21 = int_to_ptr.vmem [resolvable:$true] %s869_s21 }
  0xb7   :  { %v261_v24 = vadd.f32 %v259_v15, %v231_v22  ;;  %v262_v25 = vadd.f32 %v260_v19, %v232_v41  ;;  %s944_s22 = scalar_lea.vmem %s870_s21, 256  ;;  %p949_p1 = scmp.lt.s32.totalorder %s870_s21, %s870_s21 }
  0xb8   :  { %p945_p0 = scmp.ne.s32.totalorder %s870_s21, %s944_s22  ;;  %p950_p2 = scmp.lt.s32.totalorder %s944_s22, %s944_s22 }
  0xb9   :  { %v266_v20 = vpop.permute.xlu1 %265 }
  0xba   :  { %v268_v21 = vsel %vm267_vm8, %v264_v63, %v266_v20  ;;  %v269_v39 = vsel %vm267_vm8, %v266_v20, %v264_v63  ;;  %p951_p3 = por %p950_p2, %p949_p1 }
  0xbb   :  { %v1268_v23 = vmul.f32 %v276_v4, %v268_v21  ;;  %v1270_v42 = vmul.f32 %v280_v5, %v269_v39 }
  0xbc   :  { %p952_p4 = pnand %p951_p3, %p945_p0 }
  0xbd   :  { %v289_v26 = vmul.f32 %v287_v12, %v1268_v23  ;;  %v290_v27 = vmul.f32 %v287_v12, %v1270_v42  ;;  %v615_v6 = vpop.permute.xlu1 %614 }
  0xbf   :  { %v292_v30 = vadd.f32 %v290_v27, %v262_v25  ;;  %v291_v31 = vadd.f32 %v289_v26, %v261_v24 }
  0xc1   :  { %v300_v32 = vadd.f32 %v297_v29, %v292_v30  ;;  %v299_v35 = vadd.f32 %v297_v29, %v291_v31 }
  0xc2   :  { %v625_v13 = vpop.permute.xlu1 %624 }
  0xc3   :  { %523 = vmatprep.subr.mxu1 %v300_v32 }
  0xc4   :  { %524 = vmatpush1.msra.mxu1 %v299_v35 }
  0xc5   :  { %893 = vmatmul.mubr.msk.f32.vlgmr.msra.gmra.mxu1 %vm319_vm0, %v301_v28  ;;  %812 = vmatprep.subr.mxu1 %v300_v32 }
  0xc6   :  { %813 = vmatpush1.msra.mxu1 %v299_v35  ;;  %563 = vmatprep.mubr.f32.mxu1 %v983_v16  ;;  %v635_v35 = vpop.permute.xlu0 %634 }
  0xc7   :  { %v645_v20 = vpop.permute.xlu1 %644 }
  0xc9   :  { %894 = vmatmul.mubr.msk.f32.gmra.mxu1 %vm319_vm0, %v302_v36 }
  0xca   :  { %569 = vmatprep.mubr.f32.mxu1 %v983_v16  ;;  %v413_v51 = vpop.f32.mrf.mxu0 }
  0xcc   :  { %v415_v52 = vpop.f32.mrf.mxu0  ;;  %v655_v36 = vpop.permute.xlu1 %654 }
  0xcd   :  { %895 = vmatmul.mubr.msk.f32.gmra.mxu1 %vm319_vm0, %v303_v37 }
  0xce   :  { %575 = vmatprep.mubr.f32.mxu1 %v983_v16  ;;  %v419_v55 = vpop.f32.mrf.mxu0 }
  0xd0   :  { %v421_v56 = vpop.f32.mrf.mxu0 }
  0xd1   :  { %896 = vmatmul.mubr.msk.f32.gmra.mxu1 %vm319_vm0, %v304_v38 }
  0xd2   :  { %581 = vmatprep.mubr.f32.mxu1 %v983_v16  ;;  %v425_v57 = vpop.f32.mrf.mxu0 }
  0xd4   :  { %v427_v58 = vpop.f32.mrf.mxu0 }
  0xd5   :  { %897 = vmatmul.mubr.msk.f32.gmra.mxu1 %vm319_vm0, %v305_v44 }
  0xd6   :  { %587 = vmatprep.mubr.f32.mxu1 %v983_v16  ;;  %v431_v59 = vpop.f32.mrf.mxu0 }
  0xd8   :  { %v433_v60 = vpop.f32.mrf.mxu0 }
  0xd9   :  { %898 = vmatmul.mubr.msk.f32.gmra.mxu1 %vm319_vm0, %v306_v45 }
  0xda   :  { %593 = vmatprep.mubr.f32.mxu1 %v983_v16 }
  0xdd   :  { %899 = vmatmul.mubr.msk.f32.gmra.mxu1 %vm319_vm0, %v307_v46 }
  0xde   :  { %599 = vmatprep.mubr.f32.mxu1 %v983_v16 }
  0xe1   :  { %900 = vmatmul.mubr.msk.f32.gmra.mxu1 %vm319_vm0, %v308_v48 }
  0xe2   :  { %605 = vmatprep.mubr.f32.mxu1 %v983_v16 }
  0xe5   :  { %901 = vmatmul.mubr.msk.f32.gmra.mxu1 %vm319_vm0, %v309_v49 }
  0xe6   :  { %846 = vmatprep.mubr.f32.mxu1 %v983_v16  ;;  %v437_v16 = vpop.f32.mrf.mxu0 }
  0xe8   :  { %v439_v5 = vpop.f32.mrf.mxu0 }
  0xe9   :  { %903 = vmatmul.mubr.msk.f32.vlgmr.msra.gmra.mxu1 %vm319_vm0, %v703_v47 }
  0xea   :  { %v443_v11 = vpop.f32.mrf.mxu0 }
  0xec   :  { %v445_v15 = vpop.f32.mrf.mxu0 }
  0xee   :  { %v449_v39 = vpop.f32.mrf.mxu0 }
  0xf0   :  { %v451_v31 = vpop.f32.mrf.mxu0 }
 0x185   :  { %v559_v63 = vpop.f32.mrf.mxu1 }
 0x186   :  { %v560_v27 = vadd.f32 %v559_v63, %v413_v51 }
 0x187   :  { %v561_v4 = vpop.f32.mrf.mxu1 }
 0x188   :  { %v562_v25 = vadd.f32 %v561_v4, %v415_v52  ;;  %v617_v49 = vadd.f32 %v615_v6, %v560_v27  ;;  %v455_v52 = vpop.f32.mrf.mxu0 }
 0x189   :  { %v565_v9 = vpop.f32.mrf.mxu1 }
 0x18a   :  { %v566_v41 = vadd.f32 %v565_v9, %v419_v55  ;;  %v618_v45 = vadd.f32 %v615_v6, %v562_v25  ;;  %v665_v6 = vpop.permute.xlu0 %664 }
 0x18b   :  { %v567_v10 = vpop.f32.mrf.mxu1 }
 0x18c   :  { %v568_v22 = vadd.f32 %v567_v10, %v421_v56  ;;  %v627_v37 = vadd.f32 %v625_v13, %v566_v41 }
 0x18d   :  { %v571_v12 = vpop.f32.mrf.mxu1 }
 0x18e   :  { %v572_v29 = vadd.f32 %v571_v12, %v425_v57  ;;  %v628_v32 = vadd.f32 %v625_v13, %v568_v22  ;;  %v629_v63 = vmul.f32 %v627_v37, %v1190_v7  ;;  %v695_v37 = vpop.permute.xlu0 %694 }
 0x18f   :  { %v573_v14 = vpop.f32.mrf.mxu1 }
 0x190   :  { %v574_v26 = vadd.f32 %v573_v14, %v427_v58  ;;  %v637_v47 = vadd.f32 %v635_v35, %v572_v29  ;;  %v630_v51 = vmul.f32 %v628_v32, %v1192_v8  ;;  %v675_v58 = vpop.permute.xlu1 %674 }
 0x191   :  { %v577_v19 = vpop.f32.mrf.mxu1 }
 0x192   :  { %v578_v38 = vadd.f32 %v577_v19, %v431_v59  ;;  %v638_v46 = vadd.f32 %v635_v35, %v574_v26  ;;  %v620_v59 = vmul.f32 %v618_v45, %v1188_v2  ;;  %v639_v12 = vmul.f32 %v637_v47, %v1203_v17 }
 0x193   :  { %v579_v21 = vpop.f32.mrf.mxu1 }
 0x194   :  { %v580_v28 = vadd.f32 %v579_v21, %v433_v60  ;;  %v647_v60 = vadd.f32 %v645_v20, %v578_v38  ;;  %v640_v10 = vmul.f32 %v638_v46, %v1205_v18  ;;  %v632_v19 = vadd.f32 %v630_v51, %v620_v59  ;;  %v685_v17 = vpop.permute.xlu1 %684 }
 0x195   :  { %v583_v24 = vpop.f32.mrf.mxu1 }
 0x196   :  { %v584_v50 = vadd.f32 %v583_v24, %v437_v16  ;;  %v648_v56 = vadd.f32 %v645_v20, %v580_v28  ;;  %v619_v16 = vmul.f32 %v617_v49, %v1186_v1  ;;  %v649_v2 = vmul.f32 %v647_v60, %v1226_v33 }
 0x197   :  { %v585_v30 = vpop.f32.mrf.mxu1  ;;  %v642_v41 = vadd.f32 %v640_v10, %v632_v19 }
 0x198   :  { %v586_v48 = vadd.f32 %v585_v30, %v439_v5  ;;  %v657_v13 = vadd.f32 %v655_v36, %v584_v50  ;;  %v650_v7 = vmul.f32 %v648_v56, %v1228_v34  ;;  %v631_v21 = vadd.f32 %v629_v63, %v619_v16  ;;  %v857_v59 = vpop.permute.xlu1 %856 }
 0x199   :  { %v589_v44 = vpop.f32.mrf.mxu1 }
 0x19a   :  { %v590_v4 = vadd.f32 %v589_v44, %v443_v11  ;;  %v658_v5 = vadd.f32 %v655_v36, %v586_v48  ;;  %v641_v26 = vadd.f32 %v639_v12, %v631_v21  ;;  %v652_v34 = vadd.f32 %v650_v7, %v642_v41 }
 0x19b   :  { %v591_v55 = vpop.f32.mrf.mxu1 }
 0x19c   :  { %v592_v57 = vadd.f32 %v591_v55, %v445_v15  ;;  %v457_v15 = vpop.f32.mrf.mxu0  ;;  %v667_v22 = vadd.f32 %v665_v6, %v590_v4  ;;  %v660_v24 = vmul.f32 %v658_v5, %v1058_v3  ;;  %v651_v35 = vadd.f32 %v649_v2, %v641_v26 }
 0x19d   :  { %v595_v9 = vpop.f32.mrf.mxu1 }
 0x19e   :  { %v596_v8 = vadd.f32 %v595_v9, %v449_v39  ;;  %v668_v20 = vadd.f32 %v665_v6, %v592_v57  ;;  %v659_v39 = vmul.f32 %v657_v13, %v1048_v0  ;;  %v461_v29 = vpop.f32.mrf.mxu0  ;;  %v669_v33 = vmul.f32 %v667_v22, %v1236_v40 }
 0x19f   :  { %v597_v14 = vpop.f32.mrf.mxu1  ;;  %v662_v3 = vadd.f32 %v660_v24, %v652_v34 }
 0x1a0   :  { %v598_v11 = vadd.f32 %v597_v14, %v451_v31  ;;  %v677_v27 = vadd.f32 %v675_v58, %v596_v8  ;;  %v670_v31 = vmul.f32 %v668_v20, %v1238_v43  ;;  %v661_v46 = vadd.f32 %v659_v39, %v651_v35  ;;  %v463_v48 = vpop.f32.mrf.mxu0 }
 0x1a1   :  { %v601_v18 = vpop.f32.mrf.mxu1 }
 0x1a2   :  { %v678_v1 = vadd.f32 %v675_v58, %v598_v11  ;;  %v602_v25 = vadd.f32 %v601_v18, %v455_v52  ;;  %v679_v0 = vmul.f32 %v677_v27, %v1248_v53  ;;  %v672_v47 = vadd.f32 %v670_v31, %v662_v3 }
 0x1a3   :  { %v603_v30 = vpop.f32.mrf.mxu1  ;;  %v671_v52 = vadd.f32 %v669_v33, %v661_v46 }
 0x1a4   :  { %v604_v32 = vadd.f32 %v603_v30, %v457_v15  ;;  %v687_v28 = vadd.f32 %v685_v17, %v602_v25  ;;  %v680_v38 = vmul.f32 %v678_v1, %v1250_v54 }
 0x1a5   :  { %v607_v36 = vpop.f32.mrf.mxu1  ;;  %v681_v57 = vadd.f32 %v679_v0, %v671_v52 }
 0x1a6   :  { %v688_v44 = vadd.f32 %v685_v17, %v604_v32  ;;  %v608_v45 = vadd.f32 %v607_v36, %v461_v29  ;;  %v689_v40 = vmul.f32 %v687_v28, %v1257_v61  ;;  %v682_v51 = vadd.f32 %v680_v38, %v672_v47 }
 0x1a7   :  { %v609_v49 = vpop.f32.mrf.mxu1 }
 0x1a8   :  { %v690_v43 = vmul.f32 %v688_v44, %v1259_v62  ;;  %v697_v50 = vadd.f32 %v695_v37, %v608_v45  ;;  %v610_v55 = vadd.f32 %v609_v49, %v463_v48  ;;  %v691_v60 = vadd.f32 %v689_v40, %v681_v57  ;;  %v704_v62 = vld [vmem:[%s1360_s9] sm:$0xff] }
 0x1a9   :  { %v848_v61 = vpop.f32.mrf.mxu1 }
 0x1aa   :  { %v698_v56 = vadd.f32 %v695_v37, %v610_v55  ;;  %v699_v54 = vmul.f32 %v697_v50, %v1268_v23  ;;  %v692_v63 = vadd.f32 %v690_v43, %v682_v51 }
 0x1ab   :  { %v850_v23 = vpop.f32.mrf.mxu1 }
 0x1ac   :  { %v700_v58 = vmul.f32 %v698_v56, %v1270_v42  ;;  %v701_v4 = vadd.f32 %v699_v54, %v691_v60 }
 0x1ae   :  { %v702_v53 = vadd.f32 %v700_v58, %v692_v63 }
 0x1b0   :  { %738 = vmatprep.subr.mxu0 %v702_v53 }
 0x1b1   :  { %739 = vmatpush1.msra.mxu0 %v701_v4 }
 0x1b2   :  { %902 = vmatmul.mubr.msk.f32.vlgmr.msra.gmra.mxu0 %vm319_vm0, %v704_v62 }
 0x272   :  { %v774_v9 = vpop.f32.mrf.mxu0 }
 0x273   :  { %v849_v10 = vadd.f32 %v848_v61, %v774_v9 }
 0x274   :  { %v776_v5 = vpop.f32.mrf.mxu0 }
 0x275   :  { %v851_v42 = vadd.f32 %v850_v23, %v776_v5  ;;  %v859_v6 = vadd.f32 %v857_v59, %v849_v10 }
 0x277   :  { %v860_v16 = vadd.f32 %v857_v59, %v851_v42  ;;  %861 = vst [vmem:[#allocation2] sm:$0xff] %v859_v6 }
 0x279   :  { %862 = vst [vmem:[#allocation2 + $0x8] sm:$0xff] %v860_v16 }
 0x27a   :  { %955 = shalt.err (!%p952_p4)
}
 0x27b   :  { %872 = dma.vmem_to_hbm [thread:$0]  %s870_s21, 256, %s1362_s11, [#allocation3]  }
 0x27c   :  { %964 = dma.done.wait [#allocation3], 256  }
 0x27d   :  { %965 = vsyncadd [#allocation3], 4294967040 }
 0x27e   :  { %876 = vsyncpa [#allocation3], 1 }

</bundles_post_ra>
